<compile_context>
chip_gen: v7x
topology: tpu7x:2x2x1
jax: 0.10.0
libtpu: 0.0.40
codegen_flags: <defaults>
</compile_context>

<pallas_src>
import jax
import jax.numpy as jnp
from jax.experimental import pallas as pl
from jax.experimental.pallas import tpu as pltpu


def critic_kernel(state_ref, action_ref,
                  w1_ref, b1_ref,
                  w2s_ref, w2a_ref, b2_ref,
                  w3t_ref, b3_ref,
                  q_ref):
    # Layer 1: s = relu(state @ W1 + b1)  -- bf16 MXU operands, f32 accumulate.
    s = jnp.dot(state_ref[...], w1_ref[...],
                preferred_element_type=jnp.float32)
    s = jnp.maximum(s + b1_ref[...], 0.0)           # f32 VPU math (v5e-safe)
    s_bf16 = s.astype(jnp.bfloat16)                 # cast once for next MXU push

    # Layer 2: x = relu(cat(s, action) @ W2 + b2)
    #            = relu(s @ W2_s + action @ W2_a + b2)   (no in-kernel concat)
    x = (jnp.dot(s_bf16, w2s_ref[...], preferred_element_type=jnp.float32)
         + jnp.dot(action_ref[...], w2a_ref[...],
                   preferred_element_type=jnp.float32))
    x = jnp.maximum(x + b2_ref[...], 0.0)
    x_bf16 = x.astype(jnp.bfloat16)

    # Head: q = x @ W3 + b3, computed as (1,H)·(TB,H)^T -> (1,TB) so the
    # per-tile output is a lane-dense row (unmasked stores) rather than a
    # lane-sparse (TB,1) column from an N=1 MXU matmul.
    q = jax.lax.dot_general(
        w3t_ref[...], x_bf16,
        dimension_numbers=(((1,), (1,)), ((), ())),
        preferred_element_type=jnp.float32)
    q_ref[...] = q + b3_ref[...]


def critic_forward(state, action, params, *, tb=256):
    (w1, b1, w2s, w2a, b2, w3t, b3) = params
    B, S = state.shape
    A = action.shape[1]
    H = w1.shape[1]

    num_tiles = pl.cdiv(B, tb)
    B_pad = num_tiles * tb
    if B_pad != B:
        state = jnp.pad(state, ((0, B_pad - B), (0, 0)))
        action = jnp.pad(action, ((0, B_pad - B), (0, 0)))

    # bf16 MXU operands (native on v6e/v7x; v5e MXU also takes bf16).
    # Biases stay f32; all accumulation / bias / ReLU math is f32 in-kernel.
    state_b = state.astype(jnp.bfloat16)
    action_b = action.astype(jnp.bfloat16)
    w1_b = w1.astype(jnp.bfloat16)
    w2s_b = w2s.astype(jnp.bfloat16)
    w2a_b = w2a.astype(jnp.bfloat16)
    w3t_b = w3t.astype(jnp.bfloat16)

    # Full-array block, constant index map -> stays VMEM-resident across grid.
    const = lambda shape: pl.BlockSpec(shape, lambda i, _s=shape: tuple(0 for _ in _s))

    flops = 2 * B_pad * (S * H + H * H + A * H + H)
    bytes_accessed = (
        (state_b.size + action_b.size) * 2
        + (w1_b.size + w2s_b.size + w2a_b.size + w3t_b.size) * 2
        + (b1.size + b2.size + b3.size) * 4
        + B_pad * 4)

    q_lane = pl.pallas_call(
        critic_kernel,
        out_shape=jax.ShapeDtypeStruct((1, B_pad), jnp.float32),
        grid=(num_tiles,),
        in_specs=[
            pl.BlockSpec((tb, S), lambda i: (i, 0)),   # state rows
            pl.BlockSpec((tb, A), lambda i: (i, 0)),   # action rows
            const(w1_b.shape), const(b1.shape),
            const(w2s_b.shape), const(w2a_b.shape), const(b2.shape),
            const(w3t_b.shape), const(b3.shape),
        ],
        out_specs=pl.BlockSpec((1, tb), lambda i: (0, i)),  # lane-dense q row
        compiler_params=pltpu.CompilerParams(
            dimension_semantics=("parallel",)),
        cost_estimate=pl.CostEstimate(
            flops=flops, transcendentals=0, bytes_accessed=bytes_accessed),
    )(state_b, action_b, w1_b, b1, w2s_b, w2a_b, b2, w3t_b, b3)

    # (1, B_pad) lane-major -> (B, 1)
    return q_lane.reshape(B_pad, 1)[:B]


def init_params(key, state_size, action_size, hidden_size):
    """Deterministic init mirroring nn.Linear defaults + init_head(0.003)."""
    ks = jax.random.split(key, 6)

    def linear_init(kw, kb, fan_in, fan_out):
        bound = 1.0 / (fan_in ** 0.5)
        w = jax.random.uniform(kw, (fan_in, fan_out), jnp.float32, -bound, bound)
        b = jax.random.uniform(kb, (1, fan_out), jnp.float32, -bound, bound)
        return w, b

    # fc_state: Linear(state_size -> hidden)
    w1, b1 = linear_init(ks[0], ks[1], state_size, hidden_size)

    # fc_state_action: Linear(hidden + action_size -> hidden); split by input
    fan_in2 = hidden_size + action_size
    bound2 = 1.0 / (fan_in2 ** 0.5)
    w2 = jax.random.uniform(ks[2], (fan_in2, hidden_size), jnp.float32,
                            -bound2, bound2)
    b2 = jax.random.uniform(ks[3], (1, hidden_size), jnp.float32,
                            -bound2, bound2)
    w2s, w2a = w2[:hidden_size, :], w2[hidden_size:, :]

    # head: Linear(hidden -> 1), init_head(0.003); stored transposed as (1, H)
    w3t = jax.random.uniform(ks[4], (1, hidden_size), jnp.float32, -0.003, 0.003)
    b3 = jax.random.uniform(ks[5], (1, 1), jnp.float32, -0.003, 0.003)

    return (w1, b1, w2s, w2a, b2, w3t, b3)


def critic_ref(state, action, params):
    """Pure-JAX f32 reference matching the PyTorch module semantics."""
    (w1, b1, w2s, w2a, b2, w3t, b3) = params
    s = jnp.maximum(state @ w1 + b1, 0.0)
    x = jnp.concatenate([s, action], axis=-1)
    w2 = jnp.concatenate([w2s, w2a], axis=0)
    x = jnp.maximum(x @ w2 + b2, 0.0)
    return x @ w3t.T + b3


if __name__ == "__main__":
    B, state_size, action_size, hidden_size = 2, 16, 4, 32

    key = jax.random.PRNGKey(0)
    k_state, k_action, k_params = jax.random.split(key, 3)

    state = jax.random.normal(k_state, (B, state_size), jnp.float32)
    action = jax.random.normal(k_action, (B, action_size), jnp.float32)
    params = init_params(k_params, state_size, action_size, hidden_size)

    q = critic_forward(state, action, params)
    q = jax.block_until_ready(q)

    q_ref = critic_ref(state, action, params)
    assert q.shape == (B, 1)
    # bf16 MXU operands vs f32 reference -> loosen tolerance accordingly.
    assert jnp.allclose(q, q_ref, atol=1e-3, rtol=5e-2), (q, q_ref)

    print("KERNEL_OK")
</pallas_src>

<mosaic_0001>
module attributes {stable_mosaic.version = 11 : i64} {
  func.func @critic_kernel(%arg0: i32, %arg1: memref<256x16xbf16, #tpu.memory_space<vmem>>, %arg2: memref<256x4xbf16, #tpu.memory_space<vmem>>, %arg3: memref<16x32xbf16, #tpu.memory_space<vmem>>, %arg4: memref<1x32xf32, #tpu.memory_space<vmem>>, %arg5: memref<32x32xbf16, #tpu.memory_space<vmem>>, %arg6: memref<4x32xbf16, #tpu.memory_space<vmem>>, %arg7: memref<1x32xf32, #tpu.memory_space<vmem>>, %arg8: memref<1x32xbf16, #tpu.memory_space<vmem>>, %arg9: memref<1x1xf32, #tpu.memory_space<vmem>>, %arg10: memref<1x256xf32, #tpu.memory_space<vmem>>) attributes {dimension_semantics = [#tpu.dimension_semantics<parallel>], iteration_bounds = array<i64: 1>, scalar_prefetch = 0 : i64, scratch_operands = 0 : i64, tpu.core_type = #tpu.core_type<tc>, window_params = [{transform_indices = @transform_0, window_bounds = array<i64: 256, 16>}, {transform_indices = @transform_1, window_bounds = array<i64: 256, 4>}, {pipeline_mode = #tpu.pipeline_mode<synchronous>, transform_indices = @transform_2, window_bounds = array<i64: 16, 32>}, {pipeline_mode = #tpu.pipeline_mode<synchronous>, transform_indices = @transform_3, window_bounds = array<i64: 1, 32>}, {pipeline_mode = #tpu.pipeline_mode<synchronous>, transform_indices = @transform_4, window_bounds = array<i64: 32, 32>}, {pipeline_mode = #tpu.pipeline_mode<synchronous>, transform_indices = @transform_5, window_bounds = array<i64: 4, 32>}, {pipeline_mode = #tpu.pipeline_mode<synchronous>, transform_indices = @transform_6, window_bounds = array<i64: 1, 32>}, {pipeline_mode = #tpu.pipeline_mode<synchronous>, transform_indices = @transform_7, window_bounds = array<i64: 1, 32>}, {pipeline_mode = #tpu.pipeline_mode<synchronous>, transform_indices = @transform_8, window_bounds = array<i64: 1, 1>}, {transform_indices = @transform_9, window_bounds = array<i64: 1, 256>}]} {
    %c0 = arith.constant 0 : index
    %c0_0 = arith.constant 0 : index
    %0 = vector.load %arg1[%c0, %c0_0] : memref<256x16xbf16, #tpu.memory_space<vmem>>, vector<256x16xbf16>
    %c0_1 = arith.constant 0 : index
    %c0_2 = arith.constant 0 : index
    %1 = vector.load %arg3[%c0_1, %c0_2] : memref<16x32xbf16, #tpu.memory_space<vmem>>, vector<16x32xbf16>
    %cst = arith.constant dense<0.000000e+00> : vector<256x32xf32>
    %2 = tpu.matmul %0, %1, %cst {dimension_numbers = #tpu.dot_dimension_numbers<[1], [0], [0], [1], [0, 0, 1, 1], [], []>} : vector<256x16xbf16>, vector<16x32xbf16>, vector<256x32xf32> -> vector<256x32xf32>
    %c0_3 = arith.constant 0 : index
    %c0_4 = arith.constant 0 : index
    %3 = vector.load %arg4[%c0_3, %c0_4] : memref<1x32xf32, #tpu.memory_space<vmem>>, vector<1x32xf32>
    %4 = vector.broadcast %3 : vector<1x32xf32> to vector<256x32xf32>
    %5 = arith.addf %2, %4 : vector<256x32xf32>
    %cst_5 = arith.constant 0.000000e+00 : f32
    %6 = vector.broadcast %cst_5 : f32 to vector<256x32xf32>
    %7 = arith.maximumf %5, %6 : vector<256x32xf32>
    %8 = arith.truncf %7 : vector<256x32xf32> to vector<256x32xbf16>
    %c0_6 = arith.constant 0 : index
    %c0_7 = arith.constant 0 : index
    %9 = vector.load %arg5[%c0_6, %c0_7] : memref<32x32xbf16, #tpu.memory_space<vmem>>, vector<32x32xbf16>
    %cst_8 = arith.constant dense<0.000000e+00> : vector<256x32xf32>
    %10 = tpu.matmul %8, %9, %cst_8 {dimension_numbers = #tpu.dot_dimension_numbers<[1], [0], [0], [1], [0, 0, 1, 1], [], []>} : vector<256x32xbf16>, vector<32x32xbf16>, vector<256x32xf32> -> vector<256x32xf32>
    %c0_9 = arith.constant 0 : index
    %c0_10 = arith.constant 0 : index
    %11 = vector.load %arg2[%c0_9, %c0_10] : memref<256x4xbf16, #tpu.memory_space<vmem>>, vector<256x4xbf16>
    %c0_11 = arith.constant 0 : index
    %c0_12 = arith.constant 0 : index
    %12 = vector.load %arg6[%c0_11, %c0_12] : memref<4x32xbf16, #tpu.memory_space<vmem>>, vector<4x32xbf16>
    %cst_13 = arith.constant dense<0.000000e+00> : vector<256x32xf32>
    %13 = tpu.matmul %11, %12, %cst_13 {dimension_numbers = #tpu.dot_dimension_numbers<[1], [0], [0], [1], [0, 0, 1, 1], [], []>} : vector<256x4xbf16>, vector<4x32xbf16>, vector<256x32xf32> -> vector<256x32xf32>
    %14 = arith.addf %10, %13 : vector<256x32xf32>
    %c0_14 = arith.constant 0 : index
    %c0_15 = arith.constant 0 : index
    %15 = vector.load %arg7[%c0_14, %c0_15] : memref<1x32xf32, #tpu.memory_space<vmem>>, vector<1x32xf32>
    %16 = vector.broadcast %15 : vector<1x32xf32> to vector<256x32xf32>
    %17 = arith.addf %14, %16 : vector<256x32xf32>
    %cst_16 = arith.constant 0.000000e+00 : f32
    %18 = vector.broadcast %cst_16 : f32 to vector<256x32xf32>
    %19 = arith.maximumf %17, %18 : vector<256x32xf32>
    %20 = arith.truncf %19 : vector<256x32xf32> to vector<256x32xbf16>
    %c0_17 = arith.constant 0 : index
    %c0_18 = arith.constant 0 : index
    %21 = vector.load %arg8[%c0_17, %c0_18] : memref<1x32xbf16, #tpu.memory_space<vmem>>, vector<1x32xbf16>
    %cst_19 = arith.constant dense<0.000000e+00> : vector<1x256xf32>
    %22 = tpu.matmul %21, %20, %cst_19 {dimension_numbers = #tpu.dot_dimension_numbers<[1], [1], [0], [0], [0, 0, 1, 0], [], []>} : vector<1x32xbf16>, vector<256x32xbf16>, vector<1x256xf32> -> vector<1x256xf32>
    %c0_20 = arith.constant 0 : index
    %c0_21 = arith.constant 0 : index
    %23 = vector.load %arg9[%c0_20, %c0_21] : memref<1x1xf32, #tpu.memory_space<vmem>>, vector<1x1xf32>
    %24 = vector.broadcast %23 : vector<1x1xf32> to vector<1x256xf32>
    %25 = arith.addf %22, %24 : vector<1x256xf32>
    %c0_22 = arith.constant 0 : index
    %c0_23 = arith.constant 0 : index
    %26 = vector.load %arg10[%c0_22, %c0_23] : memref<1x256xf32, #tpu.memory_space<vmem>>, vector<1x256xf32>
    tpu.vector_store %arg10[%c0_22, %c0_23], %25 {strides = array<i32>} : memref<1x256xf32, #tpu.memory_space<vmem>>, vector<1x256xf32>,
    return
  }
  func.func @transform_0(%arg0: i32) -> (i32, i32) {
    %c0_i32 = arith.constant 0 : i32
    %c0_i32_0 = arith.constant 0 : i32
    return %arg0, %c0_i32 : i32, i32
  }
  func.func @transform_1(%arg0: i32) -> (i32, i32) {
    %c0_i32 = arith.constant 0 : i32
    %c0_i32_0 = arith.constant 0 : i32
    return %arg0, %c0_i32 : i32, i32
  }
  func.func @transform_2(%arg0: i32) -> (i32, i32) {
    %c0_i32 = arith.constant 0 : i32
    %c0_i32_0 = arith.constant 0 : i32
    %c0_i32_1 = arith.constant 0 : i32
    return %c0_i32, %c0_i32_0 : i32, i32
  }
  func.func @transform_3(%arg0: i32) -> (i32, i32) {
    %c0_i32 = arith.constant 0 : i32
    %c0_i32_0 = arith.constant 0 : i32
    %c0_i32_1 = arith.constant 0 : i32
    return %c0_i32, %c0_i32_0 : i32, i32
  }
  func.func @transform_4(%arg0: i32) -> (i32, i32) {
    %c0_i32 = arith.constant 0 : i32
    %c0_i32_0 = arith.constant 0 : i32
    %c0_i32_1 = arith.constant 0 : i32
    return %c0_i32, %c0_i32_0 : i32, i32
  }
  func.func @transform_5(%arg0: i32) -> (i32, i32) {
    %c0_i32 = arith.constant 0 : i32
    %c0_i32_0 = arith.constant 0 : i32
    %c0_i32_1 = arith.constant 0 : i32
    return %c0_i32, %c0_i32_0 : i32, i32
  }
  func.func @transform_6(%arg0: i32) -> (i32, i32) {
    %c0_i32 = arith.constant 0 : i32
    %c0_i32_0 = arith.constant 0 : i32
    %c0_i32_1 = arith.constant 0 : i32
    return %c0_i32, %c0_i32_0 : i32, i32
  }
  func.func @transform_7(%arg0: i32) -> (i32, i32) {
    %c0_i32 = arith.constant 0 : i32
    %c0_i32_0 = arith.constant 0 : i32
    %c0_i32_1 = arith.constant 0 : i32
    return %c0_i32, %c0_i32_0 : i32, i32
  }
  func.func @transform_8(%arg0: i32) -> (i32, i32) {
    %c0_i32 = arith.constant 0 : i32
    %c0_i32_0 = arith.constant 0 : i32
    %c0_i32_1 = arith.constant 0 : i32
    return %c0_i32, %c0_i32_0 : i32, i32
  }
  func.func @transform_9(%arg0: i32) -> (i32, i32) {
    %c0_i32 = arith.constant 0 : i32
    %c0_i32_0 = arith.constant 0 : i32
    return %c0_i32, %arg0 : i32, i32
  }
}

</mosaic_0001>

<bundles_post_ra>
// kernel: tpu_custom_call.1
= control target key start
LH: loop header
LB: loop body
LE: loop exit
PB: predicated region body
PF: predicated region fallthrough
CT: control target
= control target key end

     0   :  { %s1912_s0 = inlined_call_operand.vmem [shape: bf16[256,16], index: 0, kind: input, shape index: {}]   ;;  %s1913_s1 = inlined_call_operand.vmem [shape: bf16[256,4], index: 1, kind: input, shape index: {}]   ;;  %s1914_s2 = inlined_call_operand.vmem [shape: bf16[16,32], index: 2, kind: input, shape index: {}]   ;;  %s1915_s3 = inlined_call_operand.vmem [shape: f32[1,32], index: 3, kind: input, shape index: {}]   ;;  %s1916_s4 = inlined_call_operand.vmem [shape: bf16[32,32], index: 4, kind: input, shape index: {}]   ;;  %s1917_s5 = inlined_call_operand.vmem [shape: bf16[4,32], index: 5, kind: input, shape index: {}]   ;;  %s1918_s6 = inlined_call_operand.vmem [shape: f32[1,32], index: 6, kind: input, shape index: {}]   ;;  %s1919_s7 = inlined_call_operand.vmem [shape: bf16[1,32], index: 7, kind: input, shape index: {}]   ;;  %s1920_s8 = inlined_call_operand.<no memory space> [shape: f32[1,1], index: 8, kind: input, shape index: {}]   ;;  %s1921_s9 = inlined_call_operand.hbm [shape: f32[1,256], index: 9, kind: output, shape index: {}]  }
   0x1   :  { %v14_v0 = vstv %s1920_s8 }
   0x2   :  { %15 = vst [vmem:[#allocation2] sm:$0x1] %v14_v0 }
   0x3   :  { %v1506_v1 = vld [vmem:[%s1914_s2] sm:$0xff]   ;;  %vm163_vm0 = vcmask 130048   ;;  %v1508_v3 = vld [vmem:[%s1912_s0 + $0x8] sm:$0xff]   ;;  %v1509_v4 = vld [vmem:[%s1912_s0 + $0x10] sm:$0xff]   ;;  %vm587_vm1 = vcmask 1041408   ;;  %vm538_vm2 = vcmask 31744  }
   0x4   :  { %v1507_v2 = vld [vmem:[%s1912_s0] sm:$0xff]   ;;  %1357 = vmatprep.subr.bf16.mxu0 %v1506_v1  ;;  %v1510_v5 = vld [vmem:[%s1912_s0 + $0x18] sm:$0xff]   ;;  %v1512_v7 = vld [vmem:[%s1912_s0 + $0x28] sm:$0xff]  }
   0x5   :  { %1358 = vmatpush3.bf16.msra.mxu0 %v1506_v1  ;;  %1359 = vmatprep.mubr.msk.bf16.mxu0 %vm163_vm0, %v1507_v2  ;;  %v1511_v6 = vld [vmem:[%s1912_s0 + $0x20] sm:$0xff]   ;;  %v1513_v8 = vld [vmem:[%s1912_s0 + $0x30] sm:$0xff]   ;;  %v1524_v12 = vld [vmem:[%s1913_s1 + $0x8] sm:$0xff]  }
   0x6   :  { %v457_v9 = vld [vmem:[%s1917_s5] sm:$0x3]  ;;  %v1526_v14 = vld [vmem:[%s1913_s1 + $0x10] sm:$0xff]   ;;  %v1514_v15 = vld [vmem:[%s1912_s0 + $0x38] sm:$0xff]  }
   0x7   :  { %1493 = vmatprep.subr.msk.bf16.mxu1 %vm587_vm1, %v457_v9  ;;  %v589_v10 = vsel %vm587_vm1, %v457_v9, 0  ;;  %v1523_v11 = vld [vmem:[%s1913_s1] sm:$0xff]   ;;  %v1527_v17 = vld [vmem:[%s1913_s1 + $0x18] sm:$0xff]   ;;  %v1534_v19 = vld [vmem:[%s1916_s4 + $0x8] sm:$0xff]  }
   0x8   :  { %1360 = vmatmul.mubr.msk.bf16.vlgmr.msra.gmra.mrb[0].mxu0 %vm163_vm0, %v1508_v3  ;;  %1392 = vmatpush3.bf16.msra.mxu1 %v589_v10  ;;  %v1525_v13 = vld [vmem:[%s1916_s4] sm:$0xff]   ;;  %v1516_v20 = vld [vmem:[%s1912_s0 + $0x48] sm:$0xff]  }
   0x9   :  { %1363 = vmatprep.mubr.msk.bf16.mxu0 %vm163_vm0, %v1509_v4  ;;  %1393 = vmatprep.mubr.msk.bf16.mxu1 %vm538_vm2, %v1523_v11  ;;  %v1515_v16 = vld [vmem:[%s1912_s0 + $0x40] sm:$0xff]   ;;  %v1529_v21 = vld [vmem:[%s1913_s1 + $0x28] sm:$0xff]  }
   0xa   :  { %1425 = vmatprep.subr.bf16.mxu1 %v1525_v13  ;;  %v1528_v18 = vld [vmem:[%s1913_s1 + $0x20] sm:$0xff]  }
   0xb   :  { %1394 = vmatmul.mubr.msk.bf16.vlgmr.msra.gmra.mrb[0].mxu1 %vm538_vm2, %v1524_v12 }
   0xc   :  { %1426 = vmatpush3.bf16.msra.mxu1 %v1525_v13  ;;  %1397 = vmatprep.mubr.msk.bf16.mxu1 %vm538_vm2, %v1526_v14 }
   0xd   :  { %1427 = vmatprep.subr.bf16.mxu1 %v1534_v19 }
  0x10   :  { %1364 = vmatmul.mubr.msk.bf16.gmra.mrb[4].mxu0 %vm163_vm0, %v1510_v5  ;;  %1428 = vmatpush3.bf16.msra.mxu1 %v1534_v19 }
  0x11   :  { %1367 = vmatprep.mubr.msk.bf16.mxu0 %vm163_vm0, %v1511_v6 }
  0x13   :  { %1398 = vmatmul.mubr.msk.bf16.gmra.mrb[4].mxu1 %vm538_vm2, %v1527_v17 }
  0x14   :  { %1401 = vmatprep.mubr.msk.bf16.mxu1 %vm538_vm2, %v1528_v18 }
  0x18   :  { %1368 = vmatmul.mubr.msk.bf16.gmra.mrb[8].mxu0 %vm163_vm0, %v1512_v7 }
  0x19   :  { %1371 = vmatprep.mubr.msk.bf16.mxu0 %vm163_vm0, %v1513_v8 }
  0x20   :  { %1372 = vmatmul.mubr.msk.bf16.gmra.mrb[12].mxu0 %vm163_vm0, %v1514_v15 }
  0x21   :  { %1375 = vmatprep.mubr.msk.bf16.mxu0 %vm163_vm0, %v1515_v16 }
  0x22   :  { %16 = vsyncpa [#allocation4], 0  ;;  %v1517_v22 = vld [vmem:[%s1912_s0 + $0x50] sm:$0xff]   ;;  %1402 = vmatmul.mubr.msk.bf16.gmra.mrb[8].mxu1 %vm538_vm2, %v1529_v21  ;;  %v1518_v24 = vld [vmem:[%s1912_s0 + $0x58] sm:$0xff]   ;;  %vm764_vm3 = vcmask 261120  }
  0x23   :  { %v1530_v23 = vld [vmem:[%s1913_s1 + $0x30] sm:$0xff]   ;;  %v1531_v25 = vld [vmem:[%s1913_s1 + $0x38] sm:$0xff]   ;;  %v1519_v26 = vld [vmem:[%s1912_s0 + $0x60] sm:$0xff]  }
  0x24   :  { %1405 = vmatprep.mubr.msk.bf16.mxu1 %vm538_vm2, %v1530_v23  ;;  %v1532_v27 = vld [vmem:[%s1913_s1 + $0x40] sm:$0xff]   ;;  %v1520_v28 = vld [vmem:[%s1912_s0 + $0x68] sm:$0xff]   ;;  %v1521_v30 = vld [vmem:[%s1912_s0 + $0x70] sm:$0xff]  }
  0x25   :  { %v1533_v29 = vld [vmem:[%s1913_s1 + $0x48] sm:$0xff]   ;;  %v1535_v31 = vld [vmem:[%s1913_s1 + $0x50] sm:$0xff]   ;;  %v1522_v32 = vld [vmem:[%s1912_s0 + $0x78] sm:$0xff]  }
  0x26   :  { %v1536_v33 = vld [vmem:[%s1913_s1 + $0x58] sm:$0xff]   ;;  %v1537_v34 = vld [vmem:[%s1913_s1 + $0x60] sm:$0xff]   ;;  %v1538_v35 = vld [vmem:[%s1913_s1 + $0x68] sm:$0xff]  }
  0x27   :  { %v1539_v36 = vld [vmem:[%s1913_s1 + $0x70] sm:$0xff]   ;;  %v1540_v37 = vld [vmem:[%s1913_s1 + $0x78] sm:$0xff]   ;;  %v1764_v38 = vld [vmem:[%s1915_s3] ss:$0 sm:$0xff] }
  0x28   :  { %1376 = vmatmul.mubr.msk.bf16.gmra.mrb[16].mxu0 %vm163_vm0, %v1516_v20 }
  0x29   :  { %1379 = vmatprep.mubr.msk.bf16.mxu0 %vm163_vm0, %v1517_v22 }
  0x2a   :  { %1406 = vmatmul.mubr.msk.bf16.gmra.mrb[12].mxu1 %vm538_vm2, %v1531_v25 }
  0x2b   :  { %1409 = vmatprep.mubr.msk.bf16.mxu1 %vm538_vm2, %v1532_v27 }
  0x30   :  { %1380 = vmatmul.mubr.msk.bf16.gmra.mrb[20].mxu0 %vm163_vm0, %v1518_v24 }
  0x31   :  { %1383 = vmatprep.mubr.msk.bf16.mxu0 %vm163_vm0, %v1519_v26 }
  0x32   :  { %1410 = vmatmul.mubr.msk.bf16.gmra.mrb[16].mxu1 %vm538_vm2, %v1533_v29 }
  0x33   :  { %1413 = vmatprep.mubr.msk.bf16.mxu1 %vm538_vm2, %v1535_v31 }
  0x38   :  { %1384 = vmatmul.mubr.msk.bf16.gmra.mrb[24].mxu0 %vm163_vm0, %v1520_v28 }
  0x39   :  { %1387 = vmatprep.mubr.msk.bf16.mxu0 %vm163_vm0, %v1521_v30 }
  0x3a   :  { %1414 = vmatmul.mubr.msk.bf16.gmra.mrb[20].mxu1 %vm538_vm2, %v1536_v33 }
  0x3b   :  { %1417 = vmatprep.mubr.msk.bf16.mxu1 %vm538_vm2, %v1537_v34 }
  0x40   :  { %1388 = vmatmul.mubr.msk.bf16.gmra.mrb[28].mxu0 %vm163_vm0, %v1522_v32 }
  0x42   :  { %1418 = vmatmul.mubr.msk.bf16.gmra.mrb[24].mxu1 %vm538_vm2, %v1538_v35 }
  0x43   :  { %1421 = vmatprep.mubr.msk.bf16.mxu1 %vm538_vm2, %v1539_v36 }
  0x4a   :  { %1422 = vmatmul.mubr.msk.bf16.gmra.mrb[28].mxu1 %vm538_vm2, %v1540_v37 }
  0xdb   :  { %v1361_v39 = vpop.f32.mrb[0].mxu0 }
  0xdc   :  { %v255_v40 = vadd.f32 %v1361_v39, %v1764_v38  ;;  %v246_v41 = vpop.f32.mrb[1].mxu0 }
  0xdd   :  { %v247_v42 = vadd.f32 %v1764_v38, %v246_v41  ;;  %v1362_v43 = vpop.f32.mrb[2].mxu0 }
  0xde   :  { %v258_v44 = vadd.f32 %v1362_v43, %v1764_v38  ;;  %v249_v45 = vpop.f32.mrb[3].mxu0  ;;  %v375_v47 = vmax.f32 %v255_v40, 0.0 }
  0xdf   :  { %v250_v46 = vadd.f32 %v1764_v38, %v249_v45  ;;  %v373_v49 = vmax.f32 %v247_v42, 0.0 }
  0xe0   :  { %v376_v48 = vmax.f32 %v258_v44, 0.0 }
  0xe1   :  { %v374_v50 = vmax.f32 %v250_v46, 0.0 }
  0xe2   :  { %v406_v51 = vpack.c.bf16 %v376_v48, %v375_v47 }
  0xe3   :  { %v405_v52 = vpack.c.bf16 %v374_v50, %v373_v49  ;;  %v1365_v53 = vpop.f32.mrb[4].mxu0 }
  0xe4   :  { %v271_v54 = vadd.f32 %v1365_v53, %v1764_v38  ;;  %v262_v55 = vpop.f32.mrb[5].mxu0 }
  0xe5   :  { %v263_v56 = vadd.f32 %v1764_v38, %v262_v55  ;;  %v1366_v57 = vpop.f32.mrb[6].mxu0  ;;  %1429 = vmatprep.mubr.msk.bf16.mxu1 %vm764_vm3, %v405_v52 }
  0xe6   :  { %v274_v58 = vadd.f32 %v1366_v57, %v1764_v38  ;;  %v265_v59 = vpop.f32.mrb[7].mxu0  ;;  %1430 = vmatmul.mubr.msk.bf16.vlgmr.msra.gmra.mrb[0].mxu1 %vm764_vm3, %v406_v51  ;;  %v379_v61 = vmax.f32 %v271_v54, 0.0 }
  0xe7   :  { %v266_v60 = vadd.f32 %v1764_v38, %v265_v59  ;;  %v377_v63 = vmax.f32 %v263_v56, 0.0 }
  0xe8   :  { %v380_v62 = vmax.f32 %v274_v58, 0.0 }
  0xe9   :  { %v378_v0 = vmax.f32 %v266_v60, 0.0 }
  0xea   :  { %v408_v1 = vpack.c.bf16 %v380_v62, %v379_v61 }
  0xeb   :  { %v407_v2 = vpack.c.bf16 %v378_v0, %v377_v63  ;;  %v1369_v3 = vpop.f32.mrb[8].mxu0 }
  0xec   :  { %v287_v4 = vadd.f32 %v1369_v3, %v1764_v38  ;;  %v278_v5 = vpop.f32.mrb[9].mxu0 }
  0xed   :  { %v279_v6 = vadd.f32 %v1764_v38, %v278_v5  ;;  %v1370_v7 = vpop.f32.mrb[10].mxu0  ;;  %1433 = vmatprep.mubr.msk.bf16.mxu1 %vm764_vm3, %v407_v2 }
  0xee   :  { %v290_v8 = vadd.f32 %v1370_v7, %v1764_v38  ;;  %v281_v9 = vpop.f32.mrb[11].mxu0  ;;  %1434 = vmatmul.mubr.msk.bf16.gmra.mrb[4].mxu1 %vm764_vm3, %v408_v1  ;;  %v383_v11 = vmax.f32 %v287_v4, 0.0 }
  0xef   :  { %v282_v10 = vadd.f32 %v1764_v38, %v281_v9  ;;  %v381_v13 = vmax.f32 %v279_v6, 0.0 }
  0xf0   :  { %v384_v12 = vmax.f32 %v290_v8, 0.0 }
  0xf1   :  { %v382_v14 = vmax.f32 %v282_v10, 0.0 }
  0xf2   :  { %v410_v15 = vpack.c.bf16 %v384_v12, %v383_v11 }
  0xf3   :  { %v409_v16 = vpack.c.bf16 %v382_v14, %v381_v13  ;;  %v1373_v17 = vpop.f32.mrb[12].mxu0 }
  0xf4   :  { %v303_v18 = vadd.f32 %v1373_v17, %v1764_v38  ;;  %v294_v19 = vpop.f32.mrb[13].mxu0 }
  0xf5   :  { %v295_v20 = vadd.f32 %v1764_v38, %v294_v19  ;;  %v1374_v21 = vpop.f32.mrb[14].mxu0  ;;  %1437 = vmatprep.mubr.msk.bf16.mxu1 %vm764_vm3, %v409_v16 }
  0xf6   :  { %v306_v22 = vadd.f32 %v1374_v21, %v1764_v38  ;;  %v297_v23 = vpop.f32.mrb[15].mxu0  ;;  %1438 = vmatmul.mubr.msk.bf16.gmra.mrb[8].mxu1 %vm764_vm3, %v410_v15  ;;  %v387_v25 = vmax.f32 %v303_v18, 0.0 }
  0xf7   :  { %v298_v24 = vadd.f32 %v1764_v38, %v297_v23  ;;  %v385_v27 = vmax.f32 %v295_v20, 0.0 }
  0xf8   :  { %v388_v26 = vmax.f32 %v306_v22, 0.0 }
  0xf9   :  { %v386_v28 = vmax.f32 %v298_v24, 0.0  ;;  %v1817_v24 = vld [vmem:[%s1919_s7] sm:$0x1] }
  0xfa   :  { %v412_v29 = vpack.c.bf16 %v388_v26, %v387_v25  ;;  %1355 = vmatprep.mubr.msk.bf16.mxu0 %vm764_vm3, %v1817_v24  ;;  %v1062_v25 = vld [vmem:[#allocation2] sm:$0x1]  ;;  %v1565_v26 = vmov 0  }
  0xfb   :  { %v411_v30 = vpack.c.bf16 %v386_v28, %v385_v27  ;;  %v1377_v31 = vpop.f32.mrb[16].mxu0  ;;  %1505 = vset.pattern.permute.xlu0 %v1565_v26 }
  0xfc   :  { %v319_v32 = vadd.f32 %v1377_v31, %v1764_v38  ;;  %v310_v33 = vpop.f32.mrb[17].mxu0  ;;  %1065 = vperm.xlu0 %1505, %v1062_v25  }
  0xfd   :  { %v311_v34 = vadd.f32 %v1764_v38, %v310_v33  ;;  %v1378_v35 = vpop.f32.mrb[18].mxu0  ;;  %1441 = vmatprep.mubr.msk.bf16.mxu1 %vm764_vm3, %v411_v30 }
  0xfe   :  { %v322_v36 = vadd.f32 %v1378_v35, %v1764_v38  ;;  %v313_v37 = vpop.f32.mrb[19].mxu0  ;;  %1442 = vmatmul.mubr.msk.bf16.gmra.mrb[12].mxu1 %vm764_vm3, %v412_v29  ;;  %v391_v40 = vmax.f32 %v319_v32, 0.0 }
  0xff   :  { %v314_v39 = vadd.f32 %v1764_v38, %v313_v37  ;;  %v389_v42 = vmax.f32 %v311_v34, 0.0 }
 0x100   :  { %v392_v41 = vmax.f32 %v322_v36, 0.0 }
 0x101   :  { %v390_v43 = vmax.f32 %v314_v39, 0.0 }
 0x102   :  { %v414_v44 = vpack.c.bf16 %v392_v41, %v391_v40 }
 0x103   :  { %v413_v45 = vpack.c.bf16 %v390_v43, %v389_v42  ;;  %v1381_v46 = vpop.f32.mrb[20].mxu0 }
 0x104   :  { %v335_v47 = vadd.f32 %v1381_v46, %v1764_v38  ;;  %v326_v48 = vpop.f32.mrb[21].mxu0 }
 0x105   :  { %v327_v49 = vadd.f32 %v1764_v38, %v326_v48  ;;  %v1382_v50 = vpop.f32.mrb[22].mxu0  ;;  %1445 = vmatprep.mubr.msk.bf16.mxu1 %vm764_vm3, %v413_v45 }
 0x106   :  { %v395_v51 = vmax.f32 %v335_v47, 0.0  ;;  %v338_v52 = vadd.f32 %v1382_v50, %v1764_v38  ;;  %v329_v53 = vpop.f32.mrb[23].mxu0  ;;  %1446 = vmatmul.mubr.msk.bf16.gmra.mrb[16].mxu1 %vm764_vm3, %v414_v44 }
 0x107   :  { %v393_v54 = vmax.f32 %v327_v49, 0.0  ;;  %v330_v55 = vadd.f32 %v1764_v38, %v329_v53 }
 0x108   :  { %v396_v56 = vmax.f32 %v338_v52, 0.0 }
 0x109   :  { %v394_v57 = vmax.f32 %v330_v55, 0.0 }
 0x10a   :  { %v416_v58 = vpack.c.bf16 %v396_v56, %v395_v51 }
 0x10b   :  { %v415_v59 = vpack.c.bf16 %v394_v57, %v393_v54  ;;  %v1385_v60 = vpop.f32.mrb[24].mxu0 }
 0x10c   :  { %v351_v61 = vadd.f32 %v1385_v60, %v1764_v38  ;;  %v342_v62 = vpop.f32.mrb[25].mxu0 }
 0x10d   :  { %v343_v63 = vadd.f32 %v1764_v38, %v342_v62  ;;  %v1386_v0 = vpop.f32.mrb[26].mxu0  ;;  %1449 = vmatprep.mubr.msk.bf16.mxu1 %vm764_vm3, %v415_v59 }
 0x10e   :  { %v399_v1 = vmax.f32 %v351_v61, 0.0  ;;  %v354_v2 = vadd.f32 %v1386_v0, %v1764_v38  ;;  %v345_v3 = vpop.f32.mrb[27].mxu0  ;;  %1450 = vmatmul.mubr.msk.bf16.gmra.mrb[20].mxu1 %vm764_vm3, %v416_v58 }
 0x10f   :  { %v397_v4 = vmax.f32 %v343_v63, 0.0  ;;  %v346_v5 = vadd.f32 %v1764_v38, %v345_v3 }
 0x110   :  { %v400_v6 = vmax.f32 %v354_v2, 0.0 }
 0x111   :  { %v398_v7 = vmax.f32 %v346_v5, 0.0 }
 0x112   :  { %v418_v8 = vpack.c.bf16 %v400_v6, %v399_v1 }
 0x113   :  { %v417_v9 = vpack.c.bf16 %v398_v7, %v397_v4  ;;  %v1389_v10 = vpop.f32.mrb[28].mxu0 }
 0x114   :  { %v367_v11 = vadd.f32 %v1389_v10, %v1764_v38  ;;  %v358_v12 = vpop.f32.mrb[29].mxu0 }
 0x115   :  { %v359_v13 = vadd.f32 %v1764_v38, %v358_v12  ;;  %v1390_v14 = vpop.f32.mrb[30].mxu0  ;;  %1453 = vmatprep.mubr.msk.bf16.mxu1 %vm764_vm3, %v417_v9 }
 0x116   :  { %v403_v15 = vmax.f32 %v367_v11, 0.0  ;;  %v370_v16 = vadd.f32 %v1390_v14, %v1764_v38  ;;  %v361_v17 = vpop.f32.mrb[31].mxu0  ;;  %1454 = vmatmul.mubr.msk.bf16.gmra.mrb[24].mxu1 %vm764_vm3, %v418_v8 }
 0x117   :  { %v401_v18 = vmax.f32 %v359_v13, 0.0  ;;  %v362_v19 = vadd.f32 %v1764_v38, %v361_v17  ;;  %v1824_v38 = vld [vmem:[%s1918_s6] ss:$0 sm:$0xff]  ;;  %s1567_s6 = smov [#allocation3]  }
 0x118   :  { %v404_v20 = vmax.f32 %v370_v16, 0.0  ;;  %s1193_s7 = sshll.u32 %s1567_s6, 4  ;;  %s1194_s7 = int_to_ptr.vmem [resolvable:$true] %s1193_s7 }
 0x119   :  { %v402_v21 = vmax.f32 %v362_v19, 0.0  ;;  %s1541_s13 = scalar_lea.vmem %s1194_s7, 32  ;;  %p1546_p1 = scmp.lt.s32.totalorder %s1194_s7, %s1194_s7 }
 0x11a   :  { %v420_v22 = vpack.c.bf16 %v404_v20, %v403_v15  ;;  %p1542_p0 = scmp.ne.s32.totalorder %s1194_s7, %s1541_s13  ;;  %p1547_p2 = scmp.lt.s32.totalorder %s1541_s13, %s1541_s13 }
 0x11b   :  { %v419_v23 = vpack.c.bf16 %v402_v21, %v401_v18 }
 0x11c   :  { %p1548_p3 = por %p1547_p2, %p1546_p1 }
 0x11d   :  { %1457 = vmatprep.mubr.msk.bf16.mxu1 %vm764_vm3, %v419_v23 }
 0x11e   :  { %1458 = vmatmul.mubr.msk.bf16.gmra.mrb[28].mxu1 %vm764_vm3, %v420_v22  ;;  %p1549_p4 = pnand %p1548_p3, %p1542_p0 }
 0x1b9   :  { %v1431_v27 = vpop.f32.mrb[0].mxu1 }
 0x1ba   :  { %v983_v28 = vadd.f32 %v1431_v27, %v1824_v38  ;;  %v847_v29 = vpop.f32.mrb[1].mxu1 }
 0x1bb   :  { %v981_v30 = vadd.f32 %v1824_v38, %v847_v29  ;;  %v1432_v31 = vpop.f32.mrb[2].mxu1 }
 0x1bc   :  { %v984_v32 = vadd.f32 %v1432_v31, %v1824_v38  ;;  %v850_v33 = vpop.f32.mrb[3].mxu1  ;;  %v1015_v35 = vmax.f32 %v983_v28, 0.0 }
 0x1bd   :  { %v982_v34 = vadd.f32 %v1824_v38, %v850_v33  ;;  %v1013_v37 = vmax.f32 %v981_v30, 0.0 }
 0x1be   :  { %v1016_v36 = vmax.f32 %v984_v32, 0.0 }
 0x1bf   :  { %v1014_v39 = vmax.f32 %v982_v34, 0.0 }
 0x1c0   :  { %v1830_v40 = vpack.c.bf16 %v1016_v36, %v1015_v35 }
 0x1c1   :  { %v1832_v41 = vpack.c.bf16 %v1014_v39, %v1013_v37  ;;  %v1435_v42 = vpop.f32.mrb[4].mxu1 }
 0x1c2   :  { %v987_v43 = vadd.f32 %v1435_v42, %v1824_v38  ;;  %v863_v44 = vpop.f32.mrb[5].mxu1 }
 0x1c3   :  { %v985_v45 = vadd.f32 %v1824_v38, %v863_v44  ;;  %v1436_v46 = vpop.f32.mrb[6].mxu1 }
 0x1c4   :  { %v988_v47 = vadd.f32 %v1436_v46, %v1824_v38  ;;  %v866_v48 = vpop.f32.mrb[7].mxu1  ;;  %v1019_v50 = vmax.f32 %v987_v43, 0.0  ;;  %v1076_v43 = vsel %vm764_vm3, %v1832_v41, 0 }
 0x1c5   :  { %v986_v49 = vadd.f32 %v1824_v38, %v866_v48  ;;  %v1017_v52 = vmax.f32 %v985_v45, 0.0 }
 0x1c6   :  { %v1020_v51 = vmax.f32 %v988_v47, 0.0 }
 0x1c7   :  { %v1018_v53 = vmax.f32 %v986_v49, 0.0 }
 0x1c8   :  { %v1838_v54 = vpack.c.bf16 %v1020_v51, %v1019_v50 }
 0x1c9   :  { %v1840_v55 = vpack.c.bf16 %v1018_v53, %v1017_v52  ;;  %v1439_v56 = vpop.f32.mrb[8].mxu1 }
 0x1ca   :  { %v991_v57 = vadd.f32 %v1439_v56, %v1824_v38  ;;  %v879_v58 = vpop.f32.mrb[9].mxu1 }
 0x1cb   :  { %v989_v59 = vadd.f32 %v1824_v38, %v879_v58  ;;  %v1440_v60 = vpop.f32.mrb[10].mxu1 }
 0x1cc   :  { %v992_v61 = vadd.f32 %v1440_v60, %v1824_v38  ;;  %v882_v62 = vpop.f32.mrb[11].mxu1  ;;  %v1023_v0 = vmax.f32 %v991_v57, 0.0 }
 0x1cd   :  { %v990_v63 = vadd.f32 %v1824_v38, %v882_v62  ;;  %v1021_v2 = vmax.f32 %v989_v59, 0.0  ;;  %v1079_v59 = vsel %vm764_vm3, %v1830_v40, 0 }
 0x1ce   :  { %v1024_v1 = vmax.f32 %v992_v61, 0.0 }
 0x1cf   :  { %v1022_v3 = vmax.f32 %v990_v63, 0.0 }
 0x1d0   :  { %v1846_v4 = vpack.c.bf16 %v1024_v1, %v1023_v0 }
 0x1d1   :  { %v1848_v5 = vpack.c.bf16 %v1022_v3, %v1021_v2  ;;  %v1443_v6 = vpop.f32.mrb[12].mxu1 }
 0x1d2   :  { %v995_v7 = vadd.f32 %v1443_v6, %v1824_v38  ;;  %v895_v8 = vpop.f32.mrb[13].mxu1 }
 0x1d3   :  { %v993_v9 = vadd.f32 %v1824_v38, %v895_v8  ;;  %v1444_v10 = vpop.f32.mrb[14].mxu1 }
 0x1d4   :  { %v996_v11 = vadd.f32 %v1444_v10, %v1824_v38  ;;  %v898_v12 = vpop.f32.mrb[15].mxu1  ;;  %v1027_v14 = vmax.f32 %v995_v7, 0.0 }
 0x1d5   :  { %v994_v13 = vadd.f32 %v1824_v38, %v898_v12  ;;  %v1025_v16 = vmax.f32 %v993_v9, 0.0 }
 0x1d6   :  { %v1028_v15 = vmax.f32 %v996_v11, 0.0  ;;  %v1082_v11 = vsel %vm764_vm3, %v1840_v55, 0  ;;  %v1088_v55 = vsel %vm764_vm3, %v1848_v5, 0  ;;  %v1068_v5 = vlaneseq }
 0x1d7   :  { %v1026_v17 = vmax.f32 %v994_v13, 0.0 }
 0x1d8   :  { %v1854_v18 = vpack.c.bf16 %v1028_v15, %v1027_v14  ;;  %vm1184_vm4 = vcmp.lt.s32.totalorder %v1068_v5, 256 }
 0x1d9   :  { %v1856_v19 = vpack.c.bf16 %v1026_v17, %v1025_v16  ;;  %v1447_v20 = vpop.f32.mrb[16].mxu1 }
 0x1da   :  { %v999_v21 = vadd.f32 %v1447_v20, %v1824_v38  ;;  %v911_v22 = vpop.f32.mrb[17].mxu1 }
 0x1db   :  { %v997_v23 = vadd.f32 %v1824_v38, %v911_v22  ;;  %v1448_v25 = vpop.f32.mrb[18].mxu1 }
 0x1dc   :  { %v1000_v26 = vadd.f32 %v1448_v25, %v1824_v38  ;;  %v914_v27 = vpop.f32.mrb[19].mxu1  ;;  %v1031_v29 = vmax.f32 %v999_v21, 0.0  ;;  %v1094_v25 = vsel %vm764_vm3, %v1856_v19, 0 }
 0x1dd   :  { %v998_v28 = vadd.f32 %v1824_v38, %v914_v27  ;;  %v1029_v31 = vmax.f32 %v997_v23, 0.0  ;;  %v1085_v23 = vsel %vm764_vm3, %v1838_v54, 0  ;;  %v1097_v54 = vsel %vm764_vm3, %v1854_v18, 0 }
 0x1de   :  { %v1032_v30 = vmax.f32 %v1000_v26, 0.0  ;;  %v1069_v26 = vshrl.u32 %v1068_v5, 7 }
 0x1df   :  { %v1030_v32 = vmax.f32 %v998_v28, 0.0  ;;  %v1566_v28 = vmov 1966171168  }
 0x1e0   :  { %v1054_v33 = vpack.c.bf16 %v1032_v30, %v1031_v29  ;;  %v1070_v27 = vsub.s32 0, %v1069_v26  ;;  %v1168_v29 = vunpack.c.l.s4 %v1566_v28 }
 0x1e1   :  { %v1053_v34 = vpack.c.bf16 %v1030_v32, %v1029_v31  ;;  %v1451_v35 = vpop.f32.mrb[20].mxu1 }
 0x1e2   :  { %v1003_v36 = vadd.f32 %v1451_v35, %v1824_v38  ;;  %v927_v37 = vpop.f32.mrb[21].mxu1  ;;  %v1169_v31 = vunpack.c.0.s8 %v1168_v29 }
 0x1e3   :  { %v1001_v39 = vadd.f32 %v1824_v38, %v927_v37  ;;  %v1452_v42 = vpop.f32.mrb[22].mxu1  ;;  %1494 = vmatprep.subr.msk.bf16.mxu0 %vm764_vm3, %v1053_v34 }
 0x1e4   :  { %v1004_v44 = vadd.f32 %v1452_v42, %v1824_v38  ;;  %v930_v45 = vpop.f32.mrb[23].mxu1  ;;  %1340 = vmatpush3.bf16.xpose.msra.mxu0 %v1076_v43  ;;  %v1035_v47 = vmax.f32 %v1003_v36, 0.0  ;;  %v1172_v35 = vsub.s32 %v1169_v31, %v1069_v26 }
 0x1e5   :  { %v1002_v46 = vadd.f32 %v1824_v38, %v930_v45  ;;  %1495 = vmatprep.subr.msk.bf16.mxu0 %vm764_vm3, %v1054_v33  ;;  %v1033_v49 = vmax.f32 %v1001_v39, 0.0 }
 0x1e6   :  { %v1036_v48 = vmax.f32 %v1004_v44, 0.0 }
 0x1e7   :  { %v1034_v50 = vmax.f32 %v1002_v46, 0.0 }
 0x1e8   :  { %v1056_v51 = vpack.c.bf16 %v1036_v48, %v1035_v47 }
 0x1e9   :  { %v1055_v52 = vpack.c.bf16 %v1034_v50, %v1033_v49  ;;  %v1455_v53 = vpop.f32.mrb[24].mxu1 }
 0x1ea   :  { %v1007_v56 = vadd.f32 %v1455_v53, %v1824_v38  ;;  %v943_v57 = vpop.f32.mrb[25].mxu1 }
 0x1eb   :  { %v1005_v41 = vadd.f32 %v1824_v38, %v943_v57  ;;  %v1456_v58 = vpop.f32.mrb[26].mxu1 }
 0x1ec   :  { %v1008_v60 = vadd.f32 %v1456_v58, %v1824_v38  ;;  %v946_v61 = vpop.f32.mrb[27].mxu1  ;;  %1342 = vmatpush3.bf16.xpose.msra.mxu0 %v1079_v59  ;;  %v1039_v63 = vmax.f32 %v1007_v56, 0.0 }
 0x1ed   :  { %v1006_v62 = vadd.f32 %v1824_v38, %v946_v61  ;;  %1496 = vmatprep.subr.msk.bf16.mxu0 %vm764_vm3, %v1055_v52  ;;  %v1037_v1 = vmax.f32 %v1005_v41, 0.0 }
 0x1ee   :  { %v1040_v0 = vmax.f32 %v1008_v60, 0.0 }
 0x1ef   :  { %v1038_v2 = vmax.f32 %v1006_v62, 0.0 }
 0x1f0   :  { %v1058_v3 = vpack.c.bf16 %v1040_v0, %v1039_v63 }
 0x1f1   :  { %v1057_v6 = vpack.c.bf16 %v1038_v2, %v1037_v1  ;;  %v1459_v7 = vpop.f32.mrb[28].mxu1 }
 0x1f2   :  { %v1011_v8 = vadd.f32 %v1459_v7, %v1824_v38  ;;  %v959_v9 = vpop.f32.mrb[29].mxu1 }
 0x1f3   :  { %v1009_v40 = vadd.f32 %v1824_v38, %v959_v9  ;;  %v1460_v10 = vpop.f32.mrb[30].mxu1 }
 0x1f4   :  { %v1012_v12 = vadd.f32 %v1460_v10, %v1824_v38  ;;  %v962_v13 = vpop.f32.mrb[31].mxu1  ;;  %1344 = vmatpush3.bf16.xpose.msra.mxu0 %v1082_v11  ;;  %v1043_v15 = vmax.f32 %v1011_v8, 0.0 }
 0x1f5   :  { %v1010_v14 = vadd.f32 %v1824_v38, %v962_v13  ;;  %1497 = vmatprep.subr.msk.bf16.mxu0 %vm764_vm3, %v1056_v51  ;;  %v1041_v17 = vmax.f32 %v1009_v40, 0.0  ;;  %v1091_v38 = vsel %vm764_vm3, %v1846_v4, 0  ;;  %v1066_v4 = vpop.permute.xlu0 %1065 }
 0x1f6   :  { %v1044_v16 = vmax.f32 %v1012_v12, 0.0  ;;  %v1071_v30 = vrot.slane %v1066_v4, %v1070_v27 }
 0x1f7   :  { %v1042_v20 = vmax.f32 %v1010_v14, 0.0 }
 0x1f8   :  { %v1060_v21 = vpack.c.bf16 %v1044_v16, %v1043_v15 }
 0x1f9   :  { %v1059_v22 = vpack.c.bf16 %v1042_v20, %v1041_v17 }
 0x1fc   :  { %1346 = vmatpush3.bf16.xpose.msra.mxu0 %v1085_v23 }
 0x1fd   :  { %1498 = vmatprep.subr.msk.bf16.mxu0 %vm764_vm3, %v1057_v6 }
 0x204   :  { %1348 = vmatpush3.bf16.xpose.msra.mxu0 %v1088_v55 }
 0x205   :  { %1499 = vmatprep.subr.msk.bf16.mxu0 %vm764_vm3, %v1058_v3 }
 0x20c   :  { %1350 = vmatpush3.bf16.xpose.msra.mxu0 %v1091_v38 }
 0x20d   :  { %1500 = vmatprep.subr.msk.bf16.mxu0 %vm764_vm3, %v1059_v22 }
 0x214   :  { %1352 = vmatpush3.bf16.xpose.msra.mxu0 %v1094_v25 }
 0x215   :  { %1501 = vmatprep.subr.msk.bf16.mxu0 %vm764_vm3, %v1060_v21 }
 0x21c   :  { %1354 = vmatpush3.bf16.xpose.msra.mxu0 %v1097_v54 }
 0x223   :  { %1356 = vmatmul.mubr.msk.bf16.vlgmr.msra.gmra.mrb[32].mxu0 %vm764_vm3, %v1817_v24 }
 0x2f6   :  { %v1157_v32 = vpop.f32.mrb[32].mxu0 }
 0x2f7   :  { %v1158_v19 = vadd.f32 %v1157_v32, %v1071_v30  ;;  %v1159_v33 = vpop.f32.mrb[33].mxu0 }
 0x2f8   :  { %v1160_v34 = vadd.f32 %v1159_v33, %v1071_v30  ;;  %v1161_v36 = vpop.f32.mrb[34].mxu0 }
 0x2f9   :  { %v1162_v37 = vpop.f32.mrb[35].mxu0 }
 0x2fa   :  { %v1166_v18 = vcombine.low %v1158_v19, %v1160_v34 }
 0x2fc   :  { %v1173_v39 = vrot.slane %v1166_v18, %v1172_v35 }
 0x2fe   :  { %v1180_v24 = vrot.slane %v1173_v39, %v1172_v35 }
 0x300   :  { %1186 = vst.msk [vmem:[#allocation3] sm:$0x3] %vm1184_vm4, %v1180_v24 }
 0x301   :  { %1552 = shalt.err (!%p1549_p4)
}
 0x302   :  { %s1553_s15 = scalar_lea.hbm %s1921_s9, 32 }
 0x303   :  { %p1554_p5 = scmp.ne.s32.totalorder %s1921_s9, %s1553_s15  ;;  %p1557_p6 = scmp.lt.u32.totalorder %s1553_s15, %s1921_s9 }
 0x305   :  { %p1559_p7 = pnand %p1557_p6, %p1554_p5 }
 0x307   :  { %1562 = shalt.err (!%p1559_p7)
}
 0x308   :  { %1196 = dma.vmem_to_hbm [thread:$0]  %s1194_s7, 32, %s1921_s9, [#allocation4]  }
 0x309   :  { %1563 = dma.done.wait [#allocation4], 32  }
 0x30a   :  { %1564 = vsyncadd [#allocation4], 4294967264 }
 0x30b   :  { %1200 = vsyncpa [#allocation4], 1 }

</bundles_post_ra>
